<compile_context>
chip_gen: v6e
topology: v6e:2x2x1
jax: 0.10.0
libtpu: 0.0.40
codegen_flags: <defaults>
</compile_context>

<pallas_src>
import functools

import jax
import jax.numpy as jnp
from jax.experimental import pallas as pl
from jax.experimental.pallas import tpu as pltpu


def positional_encoding_kernel(x_ref, pe_ref, out_ref, *, batch):
    # x_ref / out_ref: [TS, B*D] (lane-dense minor dim), pe_ref: [TS, D].
    # Replicate pe across the B lane groups, then a single VPU add.
    pe = pe_ref[...]
    pe_tiled = jnp.concatenate([pe] * batch, axis=-1)        # [TS, B*D]
    out_ref[...] = x_ref[...] + pe_tiled
    # TODO(synk): nn.Dropout(p=0.1) is train-mode RNG; eval-mode dropout is the
    # identity, so no extra op is emitted here.


def make_pe_table(d_model, max_len=5000, dtype=jnp.float32):
    """Replicates the PyTorch buffer construction (d_model assumed even)."""
    position = jnp.arange(max_len, dtype=jnp.float32)[:, None]            # [L, 1]
    div_term = jnp.exp(jnp.arange(0, d_model, 2, dtype=jnp.float32)
                       * (-jnp.log(10000.0) / d_model))                   # [D/2]
    pe = jnp.zeros((max_len, d_model), jnp.float32)
    pe = pe.at[:, 0::2].set(jnp.sin(position * div_term))
    pe = pe.at[:, 1::2].set(jnp.cos(position * div_term))
    return pe.astype(dtype)                                               # [L, D]


def _pick_seq_block(S, row_bytes):
    # Target ~2 MiB per x/out tile: big enough to amortize the ~0.35 us
    # per-grid-step overhead (>=512-row tiles reach ~85% of HBM roofline vs
    # ~29% for 8-row tiles), small enough that double-buffered x+pe+out stays
    # well under v5e's 16 MiB default scoped VMEM and v7x's 64 MiB physical.
    target = max(8, (2 << 20) // max(row_bytes, 1))
    target = min(target, 2048)
    target = max(8, (target // 8) * 8)       # keep sublane dim a multiple of 8
    if S <= target:
        return S                             # single full-extent block (legal)
    return target                            # cdiv grid masks the ragged tail


def positional_encoding_forward(x, pe_table):
    """x: [seq, batch, d_model] (PyTorch non-batch-first layout)."""
    S, B, D = x.shape
    # Cast once in the wrapper: no per-tile cast, half the pe bytes for bf16 x.
    pe = pe_table[:S].astype(x.dtype)                                     # [S, D]
    # Free merge of contiguous (B, D) -> one lane-dense minor dim of width B*D.
    x2 = x.reshape(S, B * D)

    row_bytes = B * D * x.dtype.itemsize
    block_s = _pick_seq_block(S, row_bytes)
    grid = (pl.cdiv(S, block_s),)

    out2 = pl.pallas_call(
        functools.partial(positional_encoding_kernel, batch=B),
        out_shape=jax.ShapeDtypeStruct((S, B * D), x.dtype),
        grid=grid,
        in_specs=[
            pl.BlockSpec((block_s, B * D), lambda s: (s, 0)),             # x tile
            pl.BlockSpec((block_s, D), lambda s: (s, 0)),                 # pe tile
        ],
        out_specs=pl.BlockSpec((block_s, B * D), lambda s: (s, 0)),
        compiler_params=pltpu.CompilerParams(
            dimension_semantics=("parallel",)),
    )(x2, pe)
    return out2.reshape(S, B, D)


def _reference_forward(x, pe_table):
    """Pure-JAX reference mirroring the PyTorch forward (eval-mode dropout)."""
    S = x.shape[0]
    return x + pe_table[:S][:, None, :].astype(x.dtype)


if __name__ == "__main__":
    seq, batch, d_model = 16, 4, 128
    max_len = 5000

    key = jax.random.PRNGKey(0)
    x = jax.random.normal(key, (seq, batch, d_model), jnp.float32)

    pe_table = make_pe_table(d_model, max_len=max_len)

    fwd = jax.jit(lambda a: positional_encoding_forward(a, pe_table))
    out = fwd(x)
    jax.block_until_ready(out)

    out_ref = _reference_forward(x, pe_table)
    assert out.shape == (seq, batch, d_model)
    assert jnp.allclose(out, out_ref, atol=1e-5), "output mismatch vs reference"

    print("KERNEL_OK")
</pallas_src>

<mosaic_0001>
module attributes {stable_mosaic.version = 11 : i64} {
  func.func @positional_encoding_kernel(%arg0: i32, %arg1: memref<16x512xf32, #tpu.memory_space<vmem>>, %arg2: memref<16x128xf32, #tpu.memory_space<vmem>>, %arg3: memref<16x512xf32, #tpu.memory_space<vmem>>) attributes {dimension_semantics = [#tpu.dimension_semantics<parallel>], iteration_bounds = array<i64: 1>, scalar_prefetch = 0 : i64, scratch_operands = 0 : i64, tpu.core_type = #tpu.core_type<tc>, window_params = [{transform_indices = @transform_0, window_bounds = array<i64: 16, 512>}, {transform_indices = @transform_1, window_bounds = array<i64: 16, 128>}, {transform_indices = @transform_2, window_bounds = array<i64: 16, 512>}]} {
    %c0 = arith.constant 0 : index
    %c0_0 = arith.constant 0 : index
    %0 = vector.load %arg2[%c0, %c0_0] : memref<16x128xf32, #tpu.memory_space<vmem>>, vector<16x128xf32>
    %1 = tpu.concatenate %0, %0, %0, %0 in 1 : vector<16x128xf32>, vector<16x128xf32>, vector<16x128xf32>, vector<16x128xf32> -> vector<16x512xf32>
    %c0_1 = arith.constant 0 : index
    %c0_2 = arith.constant 0 : index
    %2 = vector.load %arg1[%c0_1, %c0_2] : memref<16x512xf32, #tpu.memory_space<vmem>>, vector<16x512xf32>
    %3 = arith.addf %2, %1 : vector<16x512xf32>
    %c0_3 = arith.constant 0 : index
    %c0_4 = arith.constant 0 : index
    %4 = vector.load %arg3[%c0_3, %c0_4] : memref<16x512xf32, #tpu.memory_space<vmem>>, vector<16x512xf32>
    tpu.vector_store %arg3[%c0_3, %c0_4], %3 {strides = array<i32>} : memref<16x512xf32, #tpu.memory_space<vmem>>, vector<16x512xf32>,
    return
  }
  func.func @transform_0(%arg0: i32) -> (i32, i32) {
    %c0_i32 = arith.constant 0 : i32
    %c0_i32_0 = arith.constant 0 : i32
    return %arg0, %c0_i32 : i32, i32
  }
  func.func @transform_1(%arg0: i32) -> (i32, i32) {
    %c0_i32 = arith.constant 0 : i32
    %c0_i32_0 = arith.constant 0 : i32
    return %arg0, %c0_i32 : i32, i32
  }
  func.func @transform_2(%arg0: i32) -> (i32, i32) {
    %c0_i32 = arith.constant 0 : i32
    %c0_i32_0 = arith.constant 0 : i32
    return %arg0, %c0_i32 : i32, i32
  }
}

</mosaic_0001>

<bundles_post_ra>
// kernel: _lambda_.1
= control target key start
LH: loop header
LB: loop body
LE: loop exit
PB: predicated region body
PF: predicated region fallthrough
CT: control target
= control target key end

     0   :  { %s110_s0 = inlined_call_operand.vmem [shape: f32[16,512], index: 0, kind: input, shape index: {}]   ;;  %s111_s1 = inlined_call_operand.vmem [shape: f32[16,128], index: 1, kind: input, shape index: {}]   ;;  %s112_s2 = inlined_call_operand.vmem [shape: f32[16,512], index: 2, kind: output, shape index: {}]  }
   0x1   :  { %v11_v0 = vld [vmem:[%s111_s1] sm:$0xff]  ;;  %v14_v2 = vld [vmem:[%s110_s0 + $0x8] sm:$0xff]  ;;  %v15_v5 = vld [vmem:[%s110_s0 + $0x10] sm:$0xff] }
   0x2   :  { %v13_v1 = vld [vmem:[%s110_s0] sm:$0xff]  ;;  %v22_v4 = vadd.f32 %v14_v2, %v11_v0  ;;  %v16_v6 = vld [vmem:[%s110_s0 + $0x18] sm:$0xff]  ;;  %v12_v7 = vld [vmem:[%s111_s1 + $0x8] sm:$0xff]  ;;  %v23_v8 = vadd.f32 %v15_v5, %v11_v0 }
   0x3   :  { %v21_v3 = vadd.f32 %v13_v1, %v11_v0  ;;  %v24_v9 = vadd.f32 %v16_v6, %v11_v0  ;;  %v17_v10 = vld [vmem:[%s110_s0 + $0x20] sm:$0xff]  ;;  %v18_v11 = vld [vmem:[%s110_s0 + $0x28] sm:$0xff]  ;;  %v19_v12 = vld [vmem:[%s110_s0 + $0x30] sm:$0xff] }
   0x4   :  { %30 = vst [vmem:[%s112_s2 + $0x8] sm:$0xff] %v22_v4  ;;  %v25_v13 = vadd.f32 %v17_v10, %v12_v7  ;;  %v26_v14 = vadd.f32 %v18_v11, %v12_v7  ;;  %v27_v15 = vadd.f32 %v19_v12, %v12_v7  ;;  %v20_v16 = vld [vmem:[%s110_s0 + $0x38] sm:$0xff]  ;;  %31 = vst [vmem:[%s112_s2 + $0x10] sm:$0xff] %v23_v8 }
   0x5   :  { %29 = vst [vmem:[%s112_s2] sm:$0xff] %v21_v3  ;;  %32 = vst [vmem:[%s112_s2 + $0x18] sm:$0xff] %v24_v9  ;;  %v28_v17 = vadd.f32 %v20_v16, %v12_v7 }
   0x6   :  { %33 = vst [vmem:[%s112_s2 + $0x20] sm:$0xff] %v25_v13  ;;  %34 = vst [vmem:[%s112_s2 + $0x28] sm:$0xff] %v26_v14 }
   0x7   :  { %35 = vst [vmem:[%s112_s2 + $0x30] sm:$0xff] %v27_v15  ;;  %36 = vst [vmem:[%s112_s2 + $0x38] sm:$0xff] %v28_v17 }

</bundles_post_ra>
